<compile_context>
chip_gen: v5e
topology: v5e:2x2
jax: 0.10.0
libtpu: 0.0.40
codegen_flags: <defaults>
</compile_context>

<pallas_src>
import functools

import jax
import jax.numpy as jnp
import numpy as np
from jax.experimental import pallas as pl
from jax.experimental.pallas import tpu as pltpu

FEATURE_WEIGHTS = [1.0, 0.5, 0.8, 0.3]
LOSS_TYPES = ["mse", "mse", "mse", "mae"]


def _rows_mask(row_iota, rows):
    """Boolean mask that is True on the given sublane (feature) indices."""
    m = row_iota == rows[0]
    for r in rows[1:]:
        m = m | (row_iota == r)
    return m


def _behavior_loss_kernel(p_ref, t_ref, out_ref, sums_ref, counts_ref, *,
                          feature_weights, loss_types, batch_size, block_b):
    i = pl.program_id(0)
    nf = len(loss_types)

    @pl.when(i == 0)
    def _():
        sums_ref[...] = jnp.zeros_like(sums_ref)
        counts_ref[...] = jnp.zeros_like(counts_ref)

    p = p_ref[...].astype(jnp.float32)          # (F, TB)
    t = t_ref[...].astype(jnp.float32)          # (F, TB)

    # Mask padded columns of a partial last block + non-finite entries.
    col = jax.lax.broadcasted_iota(jnp.int32, p.shape, 1) + i * block_b
    in_range = col < batch_size
    mask = jnp.isfinite(p) & jnp.isfinite(t) & in_range

    diff = jnp.where(mask, p - t, 0.0)          # zeroed where invalid -> no NaN propagation
    sq = diff * diff                            # mse contribution (0 where masked)
    ab = jnp.abs(diff)                          # mae contribution (0 where masked)

    # Per-feature loss-type selection baked in at compile time via sublane iota.
    row = jax.lax.broadcasted_iota(jnp.int32, p.shape, 0)
    per_elem = sq
    mae_rows = [j for j, lt in enumerate(loss_types) if lt == "mae"]
    if mae_rows:
        per_elem = jnp.where(_rows_mask(row, mae_rows), ab, per_elem)
    huber_rows = [j for j, lt in enumerate(loss_types) if lt == "huber"]
    if huber_rows:  # smooth_l1 with beta=1.0 (also 0 where masked)
        hub = jnp.where(ab < 1.0, 0.5 * sq, ab - 0.5)
        per_elem = jnp.where(_rows_mask(row, huber_rows), hub, per_elem)

    sums_ref[...] += jnp.sum(per_elem, axis=-1, keepdims=True)                    # (F, 1)
    counts_ref[...] += jnp.sum(mask.astype(jnp.float32), axis=-1, keepdims=True)  # (F, 1)

    @pl.when(i == pl.num_programs(0) - 1)
    def _():
        s = sums_ref[...]
        c = counts_ref[...]
        # Features with zero valid entries are skipped (contribute 0).
        per_feat = jnp.where(c > 0.0, s / jnp.maximum(c, 1.0), 0.0)
        frow = jax.lax.broadcasted_iota(jnp.int32, s.shape, 0)
        w = jnp.zeros_like(s)
        for j, wt in enumerate(feature_weights):
            # 1/len(loss_types) folded into the weights at trace time.
            w = jnp.where(frow == j, jnp.float32(float(wt) / nf), w)
        out_ref[0, 0] = jnp.sum(w * per_feat)


def behavior_loss(predictions, targets,
                  feature_weights=None, loss_types=None, block_b=8192):
    """predictions, targets: (B, F) arrays (any float dtype). Returns scalar f32."""
    if feature_weights is None:
        feature_weights = FEATURE_WEIGHTS
    if loss_types is None:
        loss_types = LOSS_TYPES
    B, F = predictions.shape
    assert len(feature_weights) == F and len(loss_types) == F
    for lt in loss_types:
        if lt not in ("mse", "mae", "huber"):
            raise ValueError(f"Unknown loss type: {lt}")
    assert block_b % 128 == 0

    # Lane-dense layout: features on sublanes, batch on the 128-lane axis.
    p = predictions.T                           # (F, B), native dtype
    t = targets.T

    if B <= block_b:
        tb = B                                  # single block == full array dims
    else:
        tb = block_b                            # multiple of 128
    grid = (pl.cdiv(B, tb),)

    kernel = functools.partial(
        _behavior_loss_kernel,
        feature_weights=tuple(float(w) for w in feature_weights),
        loss_types=tuple(loss_types),
        batch_size=B,
        block_b=tb,
    )

    out = pl.pallas_call(
        kernel,
        out_shape=jax.ShapeDtypeStruct((1, 1), jnp.float32),
        grid=grid,
        in_specs=[
            pl.BlockSpec((F, tb), lambda i: (0, i)),   # predictions (F, B)
            pl.BlockSpec((F, tb), lambda i: (0, i)),   # targets     (F, B)
        ],
        out_specs=pl.BlockSpec(memory_space=pltpu.MemorySpace.SMEM),
        scratch_shapes=[
            pltpu.VMEM((F, 1), jnp.float32),   # running per-feature sums
            pltpu.VMEM((F, 1), jnp.float32),   # running per-feature valid counts
        ],
        compiler_params=pltpu.CompilerParams(
            dimension_semantics=("arbitrary",)),
    )(p, t)
    return out[0, 0]


def behavior_loss_ref(predictions, targets,
                      feature_weights=None, loss_types=None):
    """Pure-JAX reference mirroring the PyTorch semantics."""
    if feature_weights is None:
        feature_weights = FEATURE_WEIGHTS
    if loss_types is None:
        loss_types = LOSS_TYPES
    predictions = predictions.astype(jnp.float32)
    targets = targets.astype(jnp.float32)
    total = jnp.float32(0.0)
    for i, (lt, w) in enumerate(zip(loss_types, feature_weights)):
        pi = predictions[:, i]
        ti = targets[:, i]
        mask = jnp.isfinite(pi) & jnp.isfinite(ti)
        cnt = jnp.sum(mask.astype(jnp.float32))
        diff = jnp.where(mask, pi - ti, 0.0)
        if lt == "mse":
            val = jnp.sum(diff * diff)
        elif lt == "mae":
            val = jnp.sum(jnp.abs(diff))
        elif lt == "huber":
            ad = jnp.abs(diff)
            val = jnp.sum(jnp.where(mask, jnp.where(ad < 1.0, 0.5 * diff * diff, ad - 0.5), 0.0))
        else:
            raise ValueError(lt)
        loss_i = jnp.where(cnt > 0, val / jnp.maximum(cnt, 1.0), 0.0)
        total = total + jnp.float32(w) * loss_i
    return total / len(loss_types)


if __name__ == "__main__":
    key = jax.random.PRNGKey(0)

    # --- small shapes matching the module: (B=8, F=4) ---
    k1, k2 = jax.random.split(key)
    B, F = 8, 4
    preds = jax.random.normal(k1, (B, F), dtype=jnp.float32)
    targs = jax.random.normal(k2, (B, F), dtype=jnp.float32)
    # Inject non-finite entries to exercise the valid-masking path.
    targs = targs.at[1, 0].set(jnp.nan)
    targs = targs.at[3, 2].set(jnp.inf)
    preds = preds.at[5, 3].set(-jnp.inf)

    out = jax.block_until_ready(behavior_loss(preds, targs))
    ref = jax.block_until_ready(behavior_loss_ref(preds, targs))
    np.testing.assert_allclose(np.asarray(out), np.asarray(ref), rtol=1e-5, atol=1e-6)

    # --- exercise the batch-grid + accumulator + partial-block masking path ---
    k3, k4 = jax.random.split(k1)
    B2 = 389  # not a multiple of 128 -> last block is partial
    preds2 = jax.random.normal(k3, (B2, F), dtype=jnp.float32)
    targs2 = jax.random.normal(k4, (B2, F), dtype=jnp.float32)
    targs2 = targs2.at[10, 1].set(jnp.nan)
    preds2 = preds2.at[200, 0].set(jnp.inf)
    targs2 = targs2.at[388, 3].set(-jnp.inf)

    out2 = jax.block_until_ready(behavior_loss(preds2, targs2, block_b=128))
    ref2 = jax.block_until_ready(behavior_loss_ref(preds2, targs2))
    np.testing.assert_allclose(np.asarray(out2), np.asarray(ref2), rtol=1e-5, atol=1e-6)

    print("KERNEL_OK")
</pallas_src>

<mosaic_0001>
module attributes {stable_mosaic.version = 11 : i64} {
  func.func @_behavior_loss_kernel(%arg0: i32, %arg1: memref<4x8xf32, #tpu.memory_space<vmem>>, %arg2: memref<4x8xf32, #tpu.memory_space<vmem>>, %arg3: memref<1x1xf32, #tpu.memory_space<smem>>, %arg4: memref<4x1xf32, #tpu.memory_space<vmem>>, %arg5: memref<4x1xf32, #tpu.memory_space<vmem>>) attributes {dimension_semantics = [#tpu.dimension_semantics<arbitrary>], iteration_bounds = array<i64: 1>, scalar_prefetch = 0 : i64, scratch_operands = 2 : i64, tpu.core_type = #tpu.core_type<tc>, window_params = [{transform_indices = @transform_0, window_bounds = array<i64: 4, 8>}, {transform_indices = @transform_1, window_bounds = array<i64: 4, 8>}, {transform_indices = @transform_2, window_bounds = array<i64: 1, 1>}]} {
    %c0_i32 = arith.constant 0 : i32
    %0 = arith.cmpi eq, %arg0, %c0_i32 : i32
    %1 = arith.extui %0 : i1 to i32
    %c0_i32_0 = arith.constant 0 : i32
    %2 = arith.cmpi ne, %1, %c0_i32_0 : i32
    scf.if %2 {
      %cst_19 = arith.constant 0.000000e+00 : f32
      %41 = vector.broadcast %cst_19 : f32 to vector<4x1xf32>
      %c0_20 = arith.constant 0 : index
      %c0_21 = arith.constant 0 : index
      %42 = vector.load %arg4[%c0_20, %c0_21] : memref<4x1xf32, #tpu.memory_space<vmem>>, vector<4x1xf32>
      tpu.vector_store %arg4[%c0_20, %c0_21], %41 {strides = array<i32>} : memref<4x1xf32, #tpu.memory_space<vmem>>, vector<4x1xf32>,
      %cst_22 = arith.constant 0.000000e+00 : f32
      %43 = vector.broadcast %cst_22 : f32 to vector<4x1xf32>
      %c0_23 = arith.constant 0 : index
      %c0_24 = arith.constant 0 : index
      %44 = vector.load %arg5[%c0_23, %c0_24] : memref<4x1xf32, #tpu.memory_space<vmem>>, vector<4x1xf32>
      tpu.vector_store %arg5[%c0_23, %c0_24], %43 {strides = array<i32>} : memref<4x1xf32, #tpu.memory_space<vmem>>, vector<4x1xf32>,
    } else {
    }
    %c0 = arith.constant 0 : index
    %c0_1 = arith.constant 0 : index
    %3 = vector.load %arg1[%c0, %c0_1] : memref<4x8xf32, #tpu.memory_space<vmem>>, vector<4x8xf32>
    %c0_2 = arith.constant 0 : index
    %c0_3 = arith.constant 0 : index
    %4 = vector.load %arg2[%c0_2, %c0_3] : memref<4x8xf32, #tpu.memory_space<vmem>>, vector<4x8xf32>
    %5 = tpu.iota {dimensions = array<i32: 1>} : vector<4x8xi32>
    %c8_i32 = arith.constant 8 : i32
    %6 = arith.muli %arg0, %c8_i32 : i32
    %7 = vector.broadcast %6 : i32 to vector<4x8xi32>
    %8 = arith.addi %5, %7 : vector<4x8xi32>
    %c8_i32_4 = arith.constant 8 : i32
    %9 = vector.broadcast %c8_i32_4 : i32 to vector<4x8xi32>
    %10 = arith.cmpi slt, %8, %9 : vector<4x8xi32>
    %11 = tpu.weird %3 : vector<4x8xf32> -> vector<4x8xi1>
    %cst = arith.constant dense<true> : vector<4x8xi1>
    %12 = arith.xori %11, %cst : vector<4x8xi1>
    %13 = tpu.weird %4 : vector<4x8xf32> -> vector<4x8xi1>
    %cst_5 = arith.constant dense<true> : vector<4x8xi1>
    %14 = arith.xori %13, %cst_5 : vector<4x8xi1>
    %15 = arith.andi %12, %14 : vector<4x8xi1>
    %16 = arith.andi %15, %10 : vector<4x8xi1>
    %17 = arith.subf %3, %4 : vector<4x8xf32>
    %cst_6 = arith.constant 0.000000e+00 : f32
    %18 = vector.broadcast %cst_6 : f32 to vector<4x8xf32>
    %19 = arith.select %16, %17, %18 : vector<4x8xi1>, vector<4x8xf32>
    %20 = arith.mulf %19, %19 : vector<4x8xf32>
    %21 = math.absf %19 : vector<4x8xf32>
    %22 = tpu.iota {dimensions = array<i32: 0>} : vector<4x8xi32>
    %c3_i32 = arith.constant 3 : i32
    %23 = vector.broadcast %c3_i32 : i32 to vector<4x8xi32>
    %24 = arith.cmpi eq, %22, %23 : vector<4x8xi32>
    %25 = arith.select %24, %21, %20 : vector<4x8xi1>, vector<4x8xf32>
    %c0_7 = arith.constant 0 : index
    %c0_8 = arith.constant 0 : index
    %26 = vector.load %arg4[%c0_7, %c0_8] : memref<4x1xf32, #tpu.memory_space<vmem>>, vector<4x1xf32>
    %cst_9 = arith.constant dense<0.000000e+00> : vector<4xf32>
    %27 = vector.multi_reduction <add>, %25, %cst_9 [1] : vector<4x8xf32> to vector<4xf32>
    %28 = vector.shape_cast %27 : vector<4xf32> to vector<4x1xf32>
    %29 = arith.addf %26, %28 : vector<4x1xf32>
    %c0_10 = arith.constant 0 : index
    %c0_11 = arith.constant 0 : index
    %30 = vector.load %arg4[%c0_10, %c0_11] : memref<4x1xf32, #tpu.memory_space<vmem>>, vector<4x1xf32>
    tpu.vector_store %arg4[%c0_10, %c0_11], %29 {strides = array<i32>} : memref<4x1xf32, #tpu.memory_space<vmem>>, vector<4x1xf32>,
    %c0_12 = arith.constant 0 : index
    %c0_13 = arith.constant 0 : index
    %31 = vector.load %arg5[%c0_12, %c0_13] : memref<4x1xf32, #tpu.memory_space<vmem>>, vector<4x1xf32>
    %32 = arith.extui %16 : vector<4x8xi1> to vector<4x8xi32>
    %33 = arith.sitofp %32 : vector<4x8xi32> to vector<4x8xf32>
    %cst_14 = arith.constant dense<0.000000e+00> : vector<4xf32>
    %34 = vector.multi_reduction <add>, %33, %cst_14 [1] : vector<4x8xf32> to vector<4xf32>
    %35 = vector.shape_cast %34 : vector<4xf32> to vector<4x1xf32>
    %36 = arith.addf %31, %35 : vector<4x1xf32>
    %c0_15 = arith.constant 0 : index
    %c0_16 = arith.constant 0 : index
    %37 = vector.load %arg5[%c0_15, %c0_16] : memref<4x1xf32, #tpu.memory_space<vmem>>, vector<4x1xf32>
    tpu.vector_store %arg5[%c0_15, %c0_16], %36 {strides = array<i32>} : memref<4x1xf32, #tpu.memory_space<vmem>>, vector<4x1xf32>,
    %c0_i32_17 = arith.constant 0 : i32
    %38 = arith.cmpi eq, %arg0, %c0_i32_17 : i32
    %39 = arith.extui %38 : i1 to i32
    %c0_i32_18 = arith.constant 0 : i32
    %40 = arith.cmpi ne, %39, %c0_i32_18 : i32
    scf.if %40 {
      %c0_19 = arith.constant 0 : index
      %c0_20 = arith.constant 0 : index
      %41 = vector.load %arg4[%c0_19, %c0_20] : memref<4x1xf32, #tpu.memory_space<vmem>>, vector<4x1xf32>
      %c0_21 = arith.constant 0 : index
      %c0_22 = arith.constant 0 : index
      %42 = vector.load %arg5[%c0_21, %c0_22] : memref<4x1xf32, #tpu.memory_space<vmem>>, vector<4x1xf32>
      %cst_23 = arith.constant 0.000000e+00 : f32
      %43 = vector.broadcast %cst_23 : f32 to vector<4x1xf32>
      %44 = arith.cmpf ogt, %42, %43 : vector<4x1xf32>
      %cst_24 = arith.constant 1.000000e+00 : f32
      %45 = vector.broadcast %cst_24 : f32 to vector<4x1xf32>
      %46 = arith.maximumf %42, %45 : vector<4x1xf32>
      %47 = arith.divf %41, %46 : vector<4x1xf32>
      %cst_25 = arith.constant 0.000000e+00 : f32
      %48 = vector.broadcast %cst_25 : f32 to vector<4x1xf32>
      %49 = arith.select %44, %47, %48 : vector<4x1xi1>, vector<4x1xf32>
      %50 = tpu.iota {dimensions = array<i32: 0>} : vector<4x1xi32>
      %cst_26 = arith.constant 0.000000e+00 : f32
      %51 = vector.broadcast %cst_26 : f32 to vector<4x1xf32>
      %c0_i32_27 = arith.constant 0 : i32
      %52 = vector.broadcast %c0_i32_27 : i32 to vector<4x1xi32>
      %53 = arith.cmpi eq, %50, %52 : vector<4x1xi32>
      %cst_28 = arith.constant 2.500000e-01 : f32
      %54 = vector.broadcast %cst_28 : f32 to vector<4x1xf32>
      %55 = arith.select %53, %54, %51 : vector<4x1xi1>, vector<4x1xf32>
      %c1_i32 = arith.constant 1 : i32
      %56 = vector.broadcast %c1_i32 : i32 to vector<4x1xi32>
      %57 = arith.cmpi eq, %50, %56 : vector<4x1xi32>
      %cst_29 = arith.constant 1.250000e-01 : f32
      %58 = vector.broadcast %cst_29 : f32 to vector<4x1xf32>
      %59 = arith.select %57, %58, %55 : vector<4x1xi1>, vector<4x1xf32>
      %c2_i32 = arith.constant 2 : i32
      %60 = vector.broadcast %c2_i32 : i32 to vector<4x1xi32>
      %61 = arith.cmpi eq, %50, %60 : vector<4x1xi32>
      %cst_30 = arith.constant 2.000000e-01 : f32
      %62 = vector.broadcast %cst_30 : f32 to vector<4x1xf32>
      %63 = arith.select %61, %62, %59 : vector<4x1xi1>, vector<4x1xf32>
      %c3_i32_31 = arith.constant 3 : i32
      %64 = vector.broadcast %c3_i32_31 : i32 to vector<4x1xi32>
      %65 = arith.cmpi eq, %50, %64 : vector<4x1xi32>
      %cst_32 = arith.constant 7.500000e-02 : f32
      %66 = vector.broadcast %cst_32 : f32 to vector<4x1xf32>
      %67 = arith.select %65, %66, %63 : vector<4x1xi1>, vector<4x1xf32>
      %68 = arith.mulf %67, %49 : vector<4x1xf32>
      %69 = vector.shape_cast %68 : vector<4x1xf32> to vector<1x4x1xf32>
      %cst_33 = arith.constant dense<0.000000e+00> : vector<1xf32>
      %70 = vector.multi_reduction <add>, %69, %cst_33 [1, 2] : vector<1x4x1xf32> to vector<1xf32>
      %71 = vector.shape_cast %70 : vector<1xf32> to vector<1x1x1xf32>
      %72 = vector.extract %71[0, 0, 0] : f32 from vector<1x1x1xf32>
      %c0_34 = arith.constant 0 : index
      %c0_35 = arith.constant 0 : index
      %73 = memref.load %arg3[%c0_34, %c0_35] : memref<1x1xf32, #tpu.memory_space<smem>>
      memref.store %72, %arg3[%c0_34, %c0_35] : memref<1x1xf32, #tpu.memory_space<smem>>
    } else {
    }
    return
  }
  func.func @transform_0(%arg0: i32) -> (i32, i32) {
    %c0_i32 = arith.constant 0 : i32
    %c0_i32_0 = arith.constant 0 : i32
    return %c0_i32, %arg0 : i32, i32
  }
  func.func @transform_1(%arg0: i32) -> (i32, i32) {
    %c0_i32 = arith.constant 0 : i32
    %c0_i32_0 = arith.constant 0 : i32
    return %c0_i32, %arg0 : i32, i32
  }
  func.func @transform_2(%arg0: i32) -> (i32, i32) {
    %c0_i32 = arith.constant 0 : i32
    %c0_i32_0 = arith.constant 0 : i32
    %c0_i32_1 = arith.constant 0 : i32
    return %c0_i32, %c0_i32_0 : i32, i32
  }
}

</mosaic_0001>

<bundles_post_ra>
// kernel: tpu_custom_call.1
= control target key start
LH: loop header
LB: loop body
LE: loop exit
PB: predicated region body
PF: predicated region fallthrough
CT: control target
= control target key end

     0   :  { %7 = vsyncpa [#allocation5], 0  ;;  %s257_s0 = inlined_call_operand.hbm [shape: f32[4,8], index: 0, kind: input, shape index: {}]   ;;  %s258_s1 = inlined_call_operand.hbm [shape: f32[4,8], index: 1, kind: input, shape index: {}]   ;;  %s259_s2 = inlined_call_operand.hbm [shape: f32[1,1], index: 2, kind: output, shape index: {}]  }
   0x1   :  { %8 = vsyncpa [#allocation8], 0 }
   0x2   :  { %9 = vsyncpa [#allocation6], 0  ;;  %s15_s11 = sshll.u32 %s257_s0, 4  ;;  %s221_s12 = smov [#allocation4]   ;;  %s16_s11 = int_to_ptr.hbm [resolvable:$true] %s15_s11 }
   0x3   :  { %s17_s13 = sshll.u32 %s221_s12, 4  ;;  %s26_s16 = sshll.u32 %s258_s1, 4  ;;  %s18_s13 = int_to_ptr.vmem [resolvable:$true] %s17_s13  ;;  %s27_s16 = int_to_ptr.hbm [resolvable:$true] %s26_s16 }
   0x4   :  { %20 = dma.hbm_to_vmem [thread:$0]  %s16_s11, 64, %s18_s13, [#allocation5]  }
   0x5   :  { %s222_s17 = smov [#allocation7]  }
   0x6   :  { %s28_s18 = sshll.u32 %s222_s17, 4  ;;  %s29_s18 = int_to_ptr.vmem [resolvable:$true] %s28_s18 }
   0x7   :  { %31 = dma.hbm_to_vmem [thread:$0]  %s27_s16, 64, %s29_s18, [#allocation8]  }
   0x8   :  { %215 = dma.done.wait [#allocation5], 64  }
   0x9   :  { %216 = vsyncadd [#allocation5], 4294967232 }
   0xa   :  { %217 = dma.done.wait [#allocation8], 64  }
   0xb   :  { %218 = vsyncadd [#allocation8], 4294967232  ;;  %v49_v0 = vlaneseq  ;;  %vm44_vm0 = vcmask 3072   ;;  %v223_v1 = vmov 0.0   ;;  %v47_v3 = vld [vmem:[#allocation4] sm:$0xf] }
   0xc   :  { %46 = vst.msk [vmem:[#allocation3] sm:$0xf] %vm44_vm0, %v223_v1  ;;  %v48_v4 = vld [vmem:[#allocation7] sm:$0xf]  ;;  %vm55_vm1 = vweird.f32 %v47_v3  ;;  %vm224_vm4 = vmmov 1   ;;  %vm70_vm8 = vcmask 60416  }
   0xd   :  { %45 = vst.msk [vmem:[#allocation2] sm:$0xf] %vm44_vm0, %v223_v1  ;;  %v50_v2 = vand.u32 127, %v49_v0  ;;  %vm57_vm2 = vweird.f32 %v48_v4  ;;  %vm56_vm5 = vmxor %vm55_vm1, %vm224_vm4  ;;  %v61_v5 = vsub.f32 %v47_v3, %v48_v4  ;;  %v66_v6 = vshrl.u32 %v49_v0, 7  ;;  %s133_s19 = sshll.u32 %s259_s2, 4  ;;  %s225_s21 = smov [#allocation9]   ;;  %s134_s19 = int_to_ptr.hbm [resolvable:$true] %s133_s19 }
   0xe   :  { %vm58_vm6 = vmxor %vm57_vm2, %vm224_vm4 }
   0xf   :  { %vm54_vm3 = vcmp.lt.s32.totalorder %v50_v2, 8  ;;  %vm59_vm7 = vmand %vm56_vm5, %vm58_vm6  ;;  %vm67_vm10 = vcmp.eq.s32.totalorder %v66_v6, 3  ;;  %vm108_vm11 = vcmp.eq.s32.totalorder %v66_v6, 0  ;;  %vm110_vm12 = vcmp.eq.s32.totalorder %v66_v6, 1 }
  0x10   :  { %vm60_vm9 = vmand %vm59_vm7, %vm54_vm3  ;;  %v109_v24 = vsel %vm108_vm11, 0.25, %v223_v1  ;;  %vm112_vm14 = vcmp.eq.s32.totalorder %v66_v6, 2 }
  0x11   :  { %v145_v7 = vsel %vm60_vm9, 1.0, %v223_v1  ;;  %v62_v8 = vsel %vm60_vm9, %v61_v5, 0.0  ;;  %v111_v27 = vsel %vm110_vm12, 0.125, %v109_v24 }
  0x12   :  { %v80_v9 = vsel %vm70_vm8, %v145_v7, 0.0  ;;  %v63_v10 = vmul.f32 %v62_v8, %v62_v8  ;;  %v64_v11 = vand.u32 2147483647, %v62_v8  ;;  %v113_v33 = vsel %vm112_vm14, 0.2, %v111_v27 }
  0x13   :  { %81 = vadd.xlane.f32.xlu0 %v80_v9  ;;  %v77_v14 = vld [vmem:[#allocation3] sm:$0xf]  ;;  %v114_v37 = vsel %vm67_vm10, 0.075, %v113_v33 }
  0x14   :  { %v68_v12 = vsel %vm67_vm10, %v64_v11, %v63_v10  ;;  %v69_v17 = vld [vmem:[#allocation2] sm:$0xf] }
  0x15   :  { %v71_v13 = vsel %vm70_vm8, %v68_v12, 0.0 }
  0x1b   :  { %72 = vadd.xlane.f32.xlu0 %v71_v13 }
  0x86   :  { %v82_v15 = vpop.xlane.xlu0 %81 }
  0x87   :  { %v83_v16 = vadd.f32 %v82_v15, %v77_v14 }
  0x89   :  { %84 = vst.msk [vmem:[#allocation3] sm:$0xf] %vm44_vm0, %v83_v16 }
  0x8e   :  { %v73_v18 = vpop.xlane.xlu0 %72 }
  0x8f   :  { %v74_v19 = vadd.f32 %v73_v18, %v69_v17 }
  0x90   :  { %v89_v20 = vld [vmem:[#allocation3] sm:$0xf] }
  0x91   :  { %76 = vst.msk [vmem:[#allocation2] sm:$0xf] %vm44_vm0, %v74_v19  ;;  %v91_v21 = vmax.f32 %v89_v20, 1.0  ;;  %vm90_vm3 = vcmp.gt.f32.partialorder %v89_v20, 0.0 }
  0x93   :  { %153 = vrcp.f32 %v91_v21  ;;  %v103_v26 = vand.u32 2147483648, %v91_v21  ;;  %v101_v29 = vand.u32 2147483647, %v91_v21  ;;  %vm97_vm15 = vweird.f32 %v91_v21 }
  0x95   :  { %v104_v32 = vor.u32 1.1754944e-38, %v103_v26  ;;  %vm102_vm2 = vcmp.eq.f32.partialorder %v101_v29, 8.507059e+37 }
  0x98   :  { %v88_v31 = vld [vmem:[#allocation2] sm:$0xf] }
  0x99   :  { %v154_v22 = vpop.eup %153 }
  0x9a   :  { %v93_v23 = vmul.f32 %v154_v22, %v91_v21  ;;  %vm98_vm13 = vweird.f32 %v154_v22 }
  0x9b   :  { %vm99_vm1 = vmor %vm97_vm15, %vm98_vm13 }
  0x9c   :  { %v94_v25 = vsub.f32 1.0, %v93_v23 }
  0x9e   :  { %v95_v28 = vmul.f32 %v154_v22, %v94_v25 }
  0xa0   :  { %v96_v30 = vadd.f32 %v154_v22, %v95_v28 }
  0xa2   :  { %v100_v34 = vsel %vm99_vm1, %v154_v22, %v96_v30 }
  0xa3   :  { %v105_v35 = vsel %vm102_vm2, %v104_v32, %v100_v34 }
  0xa4   :  { %v106_v36 = vmul.f32 %v105_v35, %v88_v31 }
  0xa6   :  { %v107_v38 = vsel %vm90_vm3, %v106_v36, 0.0 }
  0xa7   :  { %v115_v39 = vmul.f32 %v114_v37, %v107_v38 }
  0xa9   :  { %v116_v40 = vsel %vm44_vm0, %v115_v39, 0.0 }
  0xaa   :  { %117 = vadd.xlane.f32.xlu1 %v116_v40 }
 0x11d   :  { %v118_v41 = vpop.xlane.xlu1 %117 }
 0x11e   :  { %v119_v42 = vrot.slane %v118_v41, 4 }
 0x120   :  { %v120_v43 = vadd.f32 %v119_v42, %v118_v41 }
 0x122   :  { %v121_v44 = vrot.slane %v120_v43, 2 }
 0x124   :  { %v122_v45 = vadd.f32 %v121_v44, %v120_v43 }
 0x126   :  { %v123_v46 = vrot.slane %v122_v45, 1 }
 0x128   :  { %v124_v47 = vadd.f32 %v123_v46, %v122_v45 }
 0x12a   :  { %146 = vpush %v124_v47 }
 0x15b   :  { %s147_s20 = spop %146 }
 0x15c   :  { %127 = sst [smem:[#allocation9]] %s147_s20 }
 0x15d   :  { %136 = dma.smem_to_hbm %s225_s21, 16, %s134_s19, [#allocation6]  }
 0x15e   :  { %219 = dma.done.wait [#allocation6], 16  }
 0x15f   :  { %220 = vsyncadd [#allocation6], 4294967280 }
 0x160   :  { %141 = sfence }
 0x161   :  { %142 = vsyncpa [#allocation5], 1 }
 0x162   :  { %143 = vsyncpa [#allocation8], 1 }
 0x163   :  { %144 = vsyncpa [#allocation6], 1 }

</bundles_post_ra>
